<compile_context>
chip_gen: v7x
topology: tpu7x:2x2x1
jax: 0.10.0
libtpu: 0.0.40
codegen_flags: <defaults>
</compile_context>

<pallas_src>
import numpy as np
import jax
import jax.numpy as jnp
from jax.experimental import pallas as pl
from jax.experimental.pallas import tpu as pltpu

_PAD = 16  # sublane-aligned (bf16 packs 16 rows/vreg) data offset inside scratches


# -----------------------------------------------------------------------------
# Fused Pallas kernel: (concat -> conv+BN+ReLU) x3, one batch item per grid step
# -----------------------------------------------------------------------------
def _fused_upconcat_kernel(x_ref, w1_ref, w2_ref, w3_ref,
                           b1_ref, b2_ref, b3_ref, o_ref,
                           xi_ref, xb_ref):
    # x_ref : (1, H, W*Cin_pad) bf16 row-flattened channels-last concat(lhs, rhs, 0)
    # w*_ref: (3, K, W*Cout_pad) bf16 banded weights (BN scale folded, 0-padded chans)
    # b*_ref: (1, W*Cout_pad)    f32 folded BN bias tiled per pixel (0 in pad chans)
    # o_ref : (1, H, W*Cout_pad) f32 output (pad channels dropped in the wrapper)
    # xi/xb : bf16 VMEM scratches; data rows at [P, P+H), zero halo row above/below
    H = x_ref.shape[1]
    WCo = o_ref.shape[2]
    P = _PAD

    # One-time zeroing of the (aligned) halo regions; only rows P-1 and P+H are
    # ever read outside the data rows, and the data rows are fully overwritten
    # every grid step.  Scratches persist across grid iterations ("arbitrary").
    @pl.when(pl.program_id(0) == 0)
    def _():
        xi_ref[0:P, :] = jnp.zeros((P, xi_ref.shape[1]), xi_ref.dtype)
        xi_ref[P + H:2 * P + H, :] = jnp.zeros((P, xi_ref.shape[1]), xi_ref.dtype)
        xb_ref[0:P, :] = jnp.zeros((P, xb_ref.shape[1]), xb_ref.dtype)
        xb_ref[P + H:2 * P + H, :] = jnp.zeros((P, xb_ref.shape[1]), xb_ref.dtype)

    xi_ref[P:P + H, :] = x_ref[0]

    def band_conv(xp_ref, w_ref):
        # y[h] = sum_ky x[h + ky - 1, :] @ band[ky]   (bf16 MXU, f32 accumulate)
        acc = jnp.zeros((H, WCo), jnp.float32)
        for ky in range(3):
            patch = xp_ref[P - 1 + ky:P - 1 + ky + H, :]
            acc += jnp.dot(patch, w_ref[ky], preferred_element_type=jnp.float32)
        return acc

    # Layer 1 (conv_fit): the channel concat is already folded into x / the
    # banded weights, so it is a single deep (K = W*Cin_pad) matmul per tap.
    a = jnp.maximum(band_conv(xi_ref, w1_ref) + b1_ref[...], 0.0)
    xb_ref[P:P + H, :] = a.astype(xb_ref.dtype)

    # Layer 2
    a = jnp.maximum(band_conv(xb_ref, w2_ref) + b2_ref[...], 0.0)
    xb_ref[P:P + H, :] = a.astype(xb_ref.dtype)

    # Layer 3
    a = jnp.maximum(band_conv(xb_ref, w3_ref) + b3_ref[...], 0.0)
    o_ref[0] = a.astype(o_ref.dtype)


# -----------------------------------------------------------------------------
# Host-side weight transform: dense 3x3 HWIO -> banded matmul form
# -----------------------------------------------------------------------------
def _band_weights(w_hwio, W):
    """(3, 3, Cin, Cout) -> (3, W*Cin, W*Cout).

    band[ky, wi*Cin + ci, wo*Cout + co] = w[ky, wi-wo+1, ci, co] when the tap is
    in range, else 0 — i.e. the kx taps and the W-direction zero padding of a
    stride-1, pad-1 conv expressed as one matmul per ky.
    """
    Kh, Kw, Cin, Cout = w_hwio.shape
    wi = jnp.arange(W)[:, None]
    wo = jnp.arange(W)[None, :]
    kx = wi - wo + (Kw // 2)
    valid = (kx >= 0) & (kx < Kw)
    kx_c = jnp.clip(kx, 0, Kw - 1)
    g = w_hwio[:, kx_c, :, :]                       # (3, Win, Wout, Cin, Cout)
    g = g * valid[None, :, :, None, None]
    g = jnp.transpose(g, (0, 1, 3, 2, 4))           # (3, Win, Cin, Wout, Cout)
    return g.reshape(Kh, W * Cin, W * Cout)


def _lane_pad(c, W):
    """Smallest C' >= c such that W*C' is a multiple of 128 (lane-dense)."""
    g = int(128 // np.gcd(int(W), 128))
    return int(-(-int(c) // g) * g)


def _pad_axis(x, axis, new_size):
    pad = new_size - x.shape[axis]
    if pad <= 0:
        return x
    widths = [(0, 0)] * x.ndim
    widths[axis] = (0, pad)
    return jnp.pad(x, widths)


def prepare_up_concat_params(params, W):
    """One-time prep (hoisted out of the forward): fold BN scale into the conv
    weights, zero-pad channels so every in-kernel lane dim is a multiple of 128,
    expand to banded-matmul form, cast weights to bf16 and tile the biases."""
    (w1, s1, b1), (w2, s2, b2), (w3, s3, b3) = params
    cin1, cout = w1.shape[2], w1.shape[3]
    ci1p = _lane_pad(cin1, W)
    cop = _lane_pad(cout, W)

    def one(w, s, b, cin_p):
        wf = w * s[None, None, None, :]
        wf = _pad_axis(_pad_axis(wf, 3, cop), 2, cin_p)          # zero-pad channels
        band = _band_weights(wf, W).astype(jnp.bfloat16)         # (3, W*cin_p, W*cop)
        bias = jnp.tile(_pad_axis(b, 0, cop), W).reshape(1, W * cop).astype(jnp.float32)
        return band, bias

    wb1, bb1 = one(w1, s1, b1, ci1p)
    wb2, bb2 = one(w2, s2, b2, cop)
    wb3, bb3 = one(w3, s3, b3, cop)
    return (wb1, wb2, wb3, bb1, bb2, bb3)


# -----------------------------------------------------------------------------
# Plain-JAX glue: nearest upsample, make_same
# -----------------------------------------------------------------------------
def upsample_nearest_2x(x_nchw):
    # nn.Upsample(scale_factor=2), mode='nearest': out[h, w] = in[h//2, w//2]
    return jnp.repeat(jnp.repeat(x_nchw, 2, axis=2), 2, axis=3)


def make_same(good, evil):
    """Mirror of the PyTorch make_same: replicate-pad then center-crop `evil`
    to match `good`'s spatial extents (shapes are static at trace time)."""
    g, e = good.shape, evil.shape
    ndim = len(e) - 2
    pad = int(max(int(a) - int(b) for a, b in zip(g, e)))
    if pad > 0:
        pad_width = [(0, 0)] * (len(e) - ndim) + [(pad, pad)] * ndim
        evil = jnp.pad(evil, pad_width, mode="edge")   # F.pad mode='replicate'
    e = evil.shape
    for i in range(2, len(e)):
        diff = (e[i] - g[i]) // 2
        evil = jax.lax.slice_in_dim(evil, diff, diff + g[i], axis=i)
    return evil


# -----------------------------------------------------------------------------
# Parameter init (deterministic, synthetic)
# -----------------------------------------------------------------------------
def _init_conv_bn(key, cin, cout, eps=1e-5):
    k1, k2, k3, k4, k5 = jax.random.split(key, 5)
    w = jax.random.normal(k1, (3, 3, cin, cout), jnp.float32) / np.sqrt(9.0 * cin)
    gamma = 1.0 + 0.1 * jax.random.normal(k2, (cout,), jnp.float32)
    beta = 0.1 * jax.random.normal(k3, (cout,), jnp.float32)
    running_mean = 0.1 * jax.random.normal(k4, (cout,), jnp.float32)
    running_var = jnp.abs(jax.random.normal(k5, (cout,), jnp.float32)) + 0.5
    scale = gamma / jnp.sqrt(running_var + eps)
    bias = beta - running_mean * scale
    return (w, scale, bias)


def init_up_concat_params(key, in_channels, out_channels):
    k0, k1, k2 = jax.random.split(key, 3)
    return [
        _init_conv_bn(k0, in_channels + out_channels, out_channels),  # conv_fit
        _init_conv_bn(k1, out_channels, out_channels),                # conv[0]
        _init_conv_bn(k2, out_channels, out_channels),                # conv[1]
    ]


# -----------------------------------------------------------------------------
# UpConcat forward (fused kernel)
# -----------------------------------------------------------------------------
def up_concat_forward(prep, lhs_nchw, rhs_nchw, cout):
    """UpConcat.forward: upsample rhs, make_same, concat on channels, then
    ConvBNReLU x3 — the three layers fused into a single Pallas kernel."""
    wb1, wb2, wb3, bb1, bb2, bb3 = prep
    N, Cl, H, W = lhs_nchw.shape

    # Cheap glue (each fuses into small XLA copies).
    rhs = upsample_nearest_2x(rhs_nchw)
    rhs = make_same(lhs_nchw, rhs)
    Cr = rhs.shape[1]

    ci1p = wb1.shape[1] // W          # padded concat channel count
    cop = wb1.shape[2] // W           # padded output channel count
    assert ci1p >= Cl + Cr and (W * ci1p) % 128 == 0 and (W * cop) % 128 == 0

    # Channels-last, concat (matching torch.cat dim=1 order), zero-pad the
    # per-pixel channel count to lane-dense width, flatten rows, cast bf16.
    parts = [jnp.transpose(lhs_nchw, (0, 2, 3, 1)), jnp.transpose(rhs, (0, 2, 3, 1))]
    if ci1p > Cl + Cr:
        parts.append(jnp.zeros((N, H, W, ci1p - Cl - Cr), lhs_nchw.dtype))
    x_flat = jnp.concatenate(parts, axis=-1).reshape(N, H, W * ci1p).astype(jnp.bfloat16)

    WCi, WCo = W * ci1p, W * cop

    # Explicit VMEM budget: scratches + (double-buffered) weights/biases/IO.
    scratch_b = (H + 2 * _PAD) * (WCi + WCo) * 2
    weight_b = 2 * ((wb1.size + wb2.size + wb3.size) * 2 + 3 * WCo * 4)
    io_b = 2 * (H * WCi * 2 + H * WCo * 4)
    vmem_limit = min(max(int(1.5 * (scratch_b + weight_b + io_b)) + (4 << 20),
                         8 << 20), 100 << 20)

    out_flat = pl.pallas_call(
        _fused_upconcat_kernel,
        out_shape=jax.ShapeDtypeStruct((N, H, WCo), jnp.float32),
        grid=(N,),
        in_specs=[
            pl.BlockSpec((1, H, WCi), lambda n: (n, 0, 0)),
            pl.BlockSpec((3, WCi, WCo), lambda n: (0, 0, 0)),
            pl.BlockSpec((3, WCo, WCo), lambda n: (0, 0, 0)),
            pl.BlockSpec((3, WCo, WCo), lambda n: (0, 0, 0)),
            pl.BlockSpec((1, WCo), lambda n: (0, 0)),
            pl.BlockSpec((1, WCo), lambda n: (0, 0)),
            pl.BlockSpec((1, WCo), lambda n: (0, 0)),
        ],
        out_specs=pl.BlockSpec((1, H, WCo), lambda n: (n, 0, 0)),
        scratch_shapes=[
            pltpu.VMEM((H + 2 * _PAD, WCi), jnp.bfloat16),   # padded input
            pltpu.VMEM((H + 2 * _PAD, WCo), jnp.bfloat16),   # padded activations
        ],
        # "arbitrary": the once-only halo zeroing relies on in-order execution
        # and scratch persistence across grid steps (perf delta vs parallel ~0).
        compiler_params=pltpu.CompilerParams(
            dimension_semantics=("arbitrary",),
            vmem_limit_bytes=vmem_limit),
    )(x_flat, wb1, wb2, wb3, bb1, bb2, bb3)

    out = out_flat.reshape(N, H, W, cop)[..., :cout]          # drop pad channels
    return jnp.transpose(out, (0, 3, 1, 2))                   # back to NCHW


# -----------------------------------------------------------------------------
# Pure-JAX reference (eval-mode BN), used to sanity-check the fused kernel
# -----------------------------------------------------------------------------
def up_concat_reference(params, lhs_nchw, rhs_nchw):
    rhs = upsample_nearest_2x(rhs_nchw)
    rhs = make_same(lhs_nchw, rhs)
    x = jnp.transpose(jnp.concatenate([lhs_nchw, rhs], axis=1), (0, 2, 3, 1))
    for (w, scale, bias) in params:
        y = jax.lax.conv_general_dilated(
            x, w, window_strides=(1, 1), padding="SAME",
            dimension_numbers=("NHWC", "HWIO", "NHWC"),
            precision=jax.lax.Precision.HIGHEST)
        x = jnp.maximum(y * scale + bias, 0.0)
    return jnp.transpose(x, (0, 3, 1, 2))


# -----------------------------------------------------------------------------
if __name__ == "__main__":
    in_channels = 8    # channels of `rhs` (deep feature map)
    out_channels = 4   # channels of `lhs` (skip connection) and of the output
    N, H, W = 2, 16, 16

    key = jax.random.PRNGKey(0)
    k_lhs, k_rhs, k_par = jax.random.split(key, 3)

    lhs = jax.random.normal(k_lhs, (N, out_channels, H, W), jnp.float32)
    rhs = jax.random.normal(k_rhs, (N, in_channels, H // 2, W // 2), jnp.float32)

    params = init_up_concat_params(k_par, in_channels, out_channels)

    # One-time weight prep, hoisted off the per-call critical path.
    prep = prepare_up_concat_params(params, W)
    prep = jax.tree_util.tree_map(jax.block_until_ready, prep)

    fwd = jax.jit(up_concat_forward, static_argnums=(3,))
    out = jax.block_until_ready(fwd(prep, lhs, rhs, out_channels))

    assert out.shape == (N, out_channels, H, W), out.shape
    assert bool(jnp.all(jnp.isfinite(out)))

    ref = jax.block_until_ready(jax.jit(up_concat_reference)(params, lhs, rhs))
    np.testing.assert_allclose(np.asarray(out), np.asarray(ref),
                               atol=1e-1, rtol=1e-1)

    print("KERNEL_OK")
</pallas_src>

<mosaic_0001>
module attributes {stable_mosaic.version = 11 : i64} {
  func.func @_fused_upconcat_kernel(%arg0: i32, %arg1: memref<1x16x256xbf16, #tpu.memory_space<vmem>>, %arg2: memref<3x256x128xbf16, #tpu.memory_space<vmem>>, %arg3: memref<3x128x128xbf16, #tpu.memory_space<vmem>>, %arg4: memref<3x128x128xbf16, #tpu.memory_space<vmem>>, %arg5: memref<1x128xf32, #tpu.memory_space<vmem>>, %arg6: memref<1x128xf32, #tpu.memory_space<vmem>>, %arg7: memref<1x128xf32, #tpu.memory_space<vmem>>, %arg8: memref<1x16x128xf32, #tpu.memory_space<vmem>>, %arg9: memref<48x256xbf16, #tpu.memory_space<vmem>>, %arg10: memref<48x128xbf16, #tpu.memory_space<vmem>>) attributes {dimension_semantics = [#tpu.dimension_semantics<arbitrary>], iteration_bounds = array<i64: 2>, scalar_prefetch = 0 : i64, scratch_operands = 2 : i64, tpu.core_type = #tpu.core_type<tc>, window_params = [{transform_indices = @transform_0, window_bounds = array<i64: 1, 16, 256>}, {pipeline_mode = #tpu.pipeline_mode<synchronous>, transform_indices = @transform_1, window_bounds = array<i64: 3, 256, 128>}, {pipeline_mode = #tpu.pipeline_mode<synchronous>, transform_indices = @transform_2, window_bounds = array<i64: 3, 128, 128>}, {pipeline_mode = #tpu.pipeline_mode<synchronous>, transform_indices = @transform_3, window_bounds = array<i64: 3, 128, 128>}, {pipeline_mode = #tpu.pipeline_mode<synchronous>, transform_indices = @transform_4, window_bounds = array<i64: 1, 128>}, {pipeline_mode = #tpu.pipeline_mode<synchronous>, transform_indices = @transform_5, window_bounds = array<i64: 1, 128>}, {pipeline_mode = #tpu.pipeline_mode<synchronous>, transform_indices = @transform_6, window_bounds = array<i64: 1, 128>}, {transform_indices = @transform_7, window_bounds = array<i64: 1, 16, 128>}]} {
    %c0_i32 = arith.constant 0 : i32
    %0 = arith.cmpi eq, %arg0, %c0_i32 : i32
    %1 = arith.extui %0 : i1 to i32
    %c0_i32_0 = arith.constant 0 : i32
    %2 = arith.cmpi ne, %1, %c0_i32_0 : i32
    scf.if %2 {
      %cst_72 = arith.constant 0.000000e+00 : bf16
      %76 = vector.broadcast %cst_72 : bf16 to vector<16x256xbf16>
      %c0_73 = arith.constant 0 : index
      %c0_74 = arith.constant 0 : index
      %77 = vector.load %arg9[%c0_73, %c0_74] : memref<48x256xbf16, #tpu.memory_space<vmem>>, vector<16x256xbf16>
      tpu.vector_store %arg9[%c0_73, %c0_74], %76 {strides = array<i32>} : memref<48x256xbf16, #tpu.memory_space<vmem>>, vector<16x256xbf16>,
      %cst_75 = arith.constant 0.000000e+00 : bf16
      %78 = vector.broadcast %cst_75 : bf16 to vector<16x256xbf16>
      %c32 = arith.constant 32 : index
      %c0_76 = arith.constant 0 : index
      %79 = vector.load %arg9[%c32, %c0_76] : memref<48x256xbf16, #tpu.memory_space<vmem>>, vector<16x256xbf16>
      tpu.vector_store %arg9[%c32, %c0_76], %78 {strides = array<i32>} : memref<48x256xbf16, #tpu.memory_space<vmem>>, vector<16x256xbf16>,
      %cst_77 = arith.constant 0.000000e+00 : bf16
      %80 = vector.broadcast %cst_77 : bf16 to vector<16x128xbf16>
      %c0_78 = arith.constant 0 : index
      %c0_79 = arith.constant 0 : index
      %81 = vector.load %arg10[%c0_78, %c0_79] : memref<48x128xbf16, #tpu.memory_space<vmem>>, vector<16x128xbf16>
      tpu.vector_store %arg10[%c0_78, %c0_79], %80 {strides = array<i32>} : memref<48x128xbf16, #tpu.memory_space<vmem>>, vector<16x128xbf16>,
      %cst_80 = arith.constant 0.000000e+00 : bf16
      %82 = vector.broadcast %cst_80 : bf16 to vector<16x128xbf16>
      %c32_81 = arith.constant 32 : index
      %c0_82 = arith.constant 0 : index
      %83 = vector.load %arg10[%c32_81, %c0_82] : memref<48x128xbf16, #tpu.memory_space<vmem>>, vector<16x128xbf16>
      tpu.vector_store %arg10[%c32_81, %c0_82], %82 {strides = array<i32>} : memref<48x128xbf16, #tpu.memory_space<vmem>>, vector<16x128xbf16>,
    } else {
    }
    %c0 = arith.constant 0 : index
    %c0_1 = arith.constant 0 : index
    %c0_2 = arith.constant 0 : index
    %3 = vector.load %arg1[%c0, %c0_1, %c0_2] : memref<1x16x256xbf16, #tpu.memory_space<vmem>>, vector<1x16x256xbf16>
    %4 = vector.shape_cast %3 : vector<1x16x256xbf16> to vector<16x256xbf16>
    %c16 = arith.constant 16 : index
    %c0_3 = arith.constant 0 : index
    %5 = vector.load %arg9[%c16, %c0_3] : memref<48x256xbf16, #tpu.memory_space<vmem>>, vector<16x256xbf16>
    tpu.vector_store %arg9[%c16, %c0_3], %4 {strides = array<i32>} : memref<48x256xbf16, #tpu.memory_space<vmem>>, vector<16x256xbf16>,
    %cst = arith.constant 0.000000e+00 : f32
    %6 = vector.broadcast %cst : f32 to vector<16x128xf32>
    %c15 = arith.constant 15 : index
    %c0_4 = arith.constant 0 : index
    %7 = vector.load %arg9[%c15, %c0_4] : memref<48x256xbf16, #tpu.memory_space<vmem>>, vector<16x256xbf16>
    %c0_5 = arith.constant 0 : index
    %c0_6 = arith.constant 0 : index
    %c0_7 = arith.constant 0 : index
    %8 = vector.load %arg2[%c0_5, %c0_6, %c0_7] : memref<3x256x128xbf16, #tpu.memory_space<vmem>>, vector<1x256x128xbf16>
    %9 = vector.shape_cast %8 : vector<1x256x128xbf16> to vector<256x128xbf16>
    %cst_8 = arith.constant dense<0.000000e+00> : vector<16x128xf32>
    %10 = tpu.matmul %7, %9, %cst_8 {dimension_numbers = #tpu.dot_dimension_numbers<[1], [0], [0], [1], [0, 0, 1, 1], [], []>} : vector<16x256xbf16>, vector<256x128xbf16>, vector<16x128xf32> -> vector<16x128xf32>
    %11 = arith.addf %6, %10 : vector<16x128xf32>
    %c16_9 = arith.constant 16 : index
    %c0_10 = arith.constant 0 : index
    %12 = vector.load %arg9[%c16_9, %c0_10] : memref<48x256xbf16, #tpu.memory_space<vmem>>, vector<16x256xbf16>
    %c1 = arith.constant 1 : index
    %c0_11 = arith.constant 0 : index
    %c0_12 = arith.constant 0 : index
    %13 = vector.load %arg2[%c1, %c0_11, %c0_12] : memref<3x256x128xbf16, #tpu.memory_space<vmem>>, vector<1x256x128xbf16>
    %14 = vector.shape_cast %13 : vector<1x256x128xbf16> to vector<256x128xbf16>
    %cst_13 = arith.constant dense<0.000000e+00> : vector<16x128xf32>
    %15 = tpu.matmul %12, %14, %cst_13 {dimension_numbers = #tpu.dot_dimension_numbers<[1], [0], [0], [1], [0, 0, 1, 1], [], []>} : vector<16x256xbf16>, vector<256x128xbf16>, vector<16x128xf32> -> vector<16x128xf32>
    %16 = arith.addf %11, %15 : vector<16x128xf32>
    %c17 = arith.constant 17 : index
    %c0_14 = arith.constant 0 : index
    %17 = vector.load %arg9[%c17, %c0_14] : memref<48x256xbf16, #tpu.memory_space<vmem>>, vector<16x256xbf16>
    %c2 = arith.constant 2 : index
    %c0_15 = arith.constant 0 : index
    %c0_16 = arith.constant 0 : index
    %18 = vector.load %arg2[%c2, %c0_15, %c0_16] : memref<3x256x128xbf16, #tpu.memory_space<vmem>>, vector<1x256x128xbf16>
    %19 = vector.shape_cast %18 : vector<1x256x128xbf16> to vector<256x128xbf16>
    %cst_17 = arith.constant dense<0.000000e+00> : vector<16x128xf32>
    %20 = tpu.matmul %17, %19, %cst_17 {dimension_numbers = #tpu.dot_dimension_numbers<[1], [0], [0], [1], [0, 0, 1, 1], [], []>} : vector<16x256xbf16>, vector<256x128xbf16>, vector<16x128xf32> -> vector<16x128xf32>
    %21 = arith.addf %16, %20 : vector<16x128xf32>
    %c0_18 = arith.constant 0 : index
    %c0_19 = arith.constant 0 : index
    %22 = vector.load %arg5[%c0_18, %c0_19] : memref<1x128xf32, #tpu.memory_space<vmem>>, vector<1x128xf32>
    %23 = vector.broadcast %22 : vector<1x128xf32> to vector<16x128xf32>
    %24 = arith.addf %21, %23 : vector<16x128xf32>
    %cst_20 = arith.constant 0.000000e+00 : f32
    %25 = vector.broadcast %cst_20 : f32 to vector<16x128xf32>
    %26 = arith.maximumf %24, %25 : vector<16x128xf32>
    %27 = arith.truncf %26 : vector<16x128xf32> to vector<16x128xbf16>
    %c16_21 = arith.constant 16 : index
    %c0_22 = arith.constant 0 : index
    %28 = vector.load %arg10[%c16_21, %c0_22] : memref<48x128xbf16, #tpu.memory_space<vmem>>, vector<16x128xbf16>
    tpu.vector_store %arg10[%c16_21, %c0_22], %27 {strides = array<i32>} : memref<48x128xbf16, #tpu.memory_space<vmem>>, vector<16x128xbf16>,
    %cst_23 = arith.constant 0.000000e+00 : f32
    %29 = vector.broadcast %cst_23 : f32 to vector<16x128xf32>
    %c15_24 = arith.constant 15 : index
    %c0_25 = arith.constant 0 : index
    %30 = vector.load %arg10[%c15_24, %c0_25] : memref<48x128xbf16, #tpu.memory_space<vmem>>, vector<16x128xbf16>
    %c0_26 = arith.constant 0 : index
    %c0_27 = arith.constant 0 : index
    %c0_28 = arith.constant 0 : index
    %31 = vector.load %arg3[%c0_26, %c0_27, %c0_28] : memref<3x128x128xbf16, #tpu.memory_space<vmem>>, vector<1x128x128xbf16>
    %32 = vector.shape_cast %31 : vector<1x128x128xbf16> to vector<128x128xbf16>
    %cst_29 = arith.constant dense<0.000000e+00> : vector<16x128xf32>
    %33 = tpu.matmul %30, %32, %cst_29 {dimension_numbers = #tpu.dot_dimension_numbers<[1], [0], [0], [1], [0, 0, 1, 1], [], []>} : vector<16x128xbf16>, vector<128x128xbf16>, vector<16x128xf32> -> vector<16x128xf32>
    %34 = arith.addf %29, %33 : vector<16x128xf32>
    %c16_30 = arith.constant 16 : index
    %c0_31 = arith.constant 0 : index
    %35 = vector.load %arg10[%c16_30, %c0_31] : memref<48x128xbf16, #tpu.memory_space<vmem>>, vector<16x128xbf16>
    %c1_32 = arith.constant 1 : index
    %c0_33 = arith.constant 0 : index
    %c0_34 = arith.constant 0 : index
    %36 = vector.load %arg3[%c1_32, %c0_33, %c0_34] : memref<3x128x128xbf16, #tpu.memory_space<vmem>>, vector<1x128x128xbf16>
    %37 = vector.shape_cast %36 : vector<1x128x128xbf16> to vector<128x128xbf16>
    %cst_35 = arith.constant dense<0.000000e+00> : vector<16x128xf32>
    %38 = tpu.matmul %35, %37, %cst_35 {dimension_numbers = #tpu.dot_dimension_numbers<[1], [0], [0], [1], [0, 0, 1, 1], [], []>} : vector<16x128xbf16>, vector<128x128xbf16>, vector<16x128xf32> -> vector<16x128xf32>
    %39 = arith.addf %34, %38 : vector<16x128xf32>
    %c17_36 = arith.constant 17 : index
    %c0_37 = arith.constant 0 : index
    %40 = vector.load %arg10[%c17_36, %c0_37] : memref<48x128xbf16, #tpu.memory_space<vmem>>, vector<16x128xbf16>
    %c2_38 = arith.constant 2 : index
    %c0_39 = arith.constant 0 : index
    %c0_40 = arith.constant 0 : index
    %41 = vector.load %arg3[%c2_38, %c0_39, %c0_40] : memref<3x128x128xbf16, #tpu.memory_space<vmem>>, vector<1x128x128xbf16>
    %42 = vector.shape_cast %41 : vector<1x128x128xbf16> to vector<128x128xbf16>
    %cst_41 = arith.constant dense<0.000000e+00> : vector<16x128xf32>
    %43 = tpu.matmul %40, %42, %cst_41 {dimension_numbers = #tpu.dot_dimension_numbers<[1], [0], [0], [1], [0, 0, 1, 1], [], []>} : vector<16x128xbf16>, vector<128x128xbf16>, vector<16x128xf32> -> vector<16x128xf32>
    %44 = arith.addf %39, %43 : vector<16x128xf32>
    %c0_42 = arith.constant 0 : index
    %c0_43 = arith.constant 0 : index
    %45 = vector.load %arg6[%c0_42, %c0_43] : memref<1x128xf32, #tpu.memory_space<vmem>>, vector<1x128xf32>
    %46 = vector.broadcast %45 : vector<1x128xf32> to vector<16x128xf32>
    %47 = arith.addf %44, %46 : vector<16x128xf32>
    %cst_44 = arith.constant 0.000000e+00 : f32
    %48 = vector.broadcast %cst_44 : f32 to vector<16x128xf32>
    %49 = arith.maximumf %47, %48 : vector<16x128xf32>
    %50 = arith.truncf %49 : vector<16x128xf32> to vector<16x128xbf16>
    %c16_45 = arith.constant 16 : index
    %c0_46 = arith.constant 0 : index
    %51 = vector.load %arg10[%c16_45, %c0_46] : memref<48x128xbf16, #tpu.memory_space<vmem>>, vector<16x128xbf16>
    tpu.vector_store %arg10[%c16_45, %c0_46], %50 {strides = array<i32>} : memref<48x128xbf16, #tpu.memory_space<vmem>>, vector<16x128xbf16>,
    %cst_47 = arith.constant 0.000000e+00 : f32
    %52 = vector.broadcast %cst_47 : f32 to vector<16x128xf32>
    %c15_48 = arith.constant 15 : index
    %c0_49 = arith.constant 0 : index
    %53 = vector.load %arg10[%c15_48, %c0_49] : memref<48x128xbf16, #tpu.memory_space<vmem>>, vector<16x128xbf16>
    %c0_50 = arith.constant 0 : index
    %c0_51 = arith.constant 0 : index
    %c0_52 = arith.constant 0 : index
    %54 = vector.load %arg4[%c0_50, %c0_51, %c0_52] : memref<3x128x128xbf16, #tpu.memory_space<vmem>>, vector<1x128x128xbf16>
    %55 = vector.shape_cast %54 : vector<1x128x128xbf16> to vector<128x128xbf16>
    %cst_53 = arith.constant dense<0.000000e+00> : vector<16x128xf32>
    %56 = tpu.matmul %53, %55, %cst_53 {dimension_numbers = #tpu.dot_dimension_numbers<[1], [0], [0], [1], [0, 0, 1, 1], [], []>} : vector<16x128xbf16>, vector<128x128xbf16>, vector<16x128xf32> -> vector<16x128xf32>
    %57 = arith.addf %52, %56 : vector<16x128xf32>
    %c16_54 = arith.constant 16 : index
    %c0_55 = arith.constant 0 : index
    %58 = vector.load %arg10[%c16_54, %c0_55] : memref<48x128xbf16, #tpu.memory_space<vmem>>, vector<16x128xbf16>
    %c1_56 = arith.constant 1 : index
    %c0_57 = arith.constant 0 : index
    %c0_58 = arith.constant 0 : index
    %59 = vector.load %arg4[%c1_56, %c0_57, %c0_58] : memref<3x128x128xbf16, #tpu.memory_space<vmem>>, vector<1x128x128xbf16>
    %60 = vector.shape_cast %59 : vector<1x128x128xbf16> to vector<128x128xbf16>
    %cst_59 = arith.constant dense<0.000000e+00> : vector<16x128xf32>
    %61 = tpu.matmul %58, %60, %cst_59 {dimension_numbers = #tpu.dot_dimension_numbers<[1], [0], [0], [1], [0, 0, 1, 1], [], []>} : vector<16x128xbf16>, vector<128x128xbf16>, vector<16x128xf32> -> vector<16x128xf32>
    %62 = arith.addf %57, %61 : vector<16x128xf32>
    %c17_60 = arith.constant 17 : index
    %c0_61 = arith.constant 0 : index
    %63 = vector.load %arg10[%c17_60, %c0_61] : memref<48x128xbf16, #tpu.memory_space<vmem>>, vector<16x128xbf16>
    %c2_62 = arith.constant 2 : index
    %c0_63 = arith.constant 0 : index
    %c0_64 = arith.constant 0 : index
    %64 = vector.load %arg4[%c2_62, %c0_63, %c0_64] : memref<3x128x128xbf16, #tpu.memory_space<vmem>>, vector<1x128x128xbf16>
    %65 = vector.shape_cast %64 : vector<1x128x128xbf16> to vector<128x128xbf16>
    %cst_65 = arith.constant dense<0.000000e+00> : vector<16x128xf32>
    %66 = tpu.matmul %63, %65, %cst_65 {dimension_numbers = #tpu.dot_dimension_numbers<[1], [0], [0], [1], [0, 0, 1, 1], [], []>} : vector<16x128xbf16>, vector<128x128xbf16>, vector<16x128xf32> -> vector<16x128xf32>
    %67 = arith.addf %62, %66 : vector<16x128xf32>
    %c0_66 = arith.constant 0 : index
    %c0_67 = arith.constant 0 : index
    %68 = vector.load %arg7[%c0_66, %c0_67] : memref<1x128xf32, #tpu.memory_space<vmem>>, vector<1x128xf32>
    %69 = vector.broadcast %68 : vector<1x128xf32> to vector<16x128xf32>
    %70 = arith.addf %67, %69 : vector<16x128xf32>
    %cst_68 = arith.constant 0.000000e+00 : f32
    %71 = vector.broadcast %cst_68 : f32 to vector<16x128xf32>
    %72 = arith.maximumf %70, %71 : vector<16x128xf32>
    %c0_69 = arith.constant 0 : index
    %c0_70 = arith.constant 0 : index
    %c0_71 = arith.constant 0 : index
    %73 = vector.load %arg8[%c0_69, %c0_70, %c0_71] : memref<1x16x128xf32, #tpu.memory_space<vmem>>, vector<1x16x128xf32>
    %74 = vector.shape_cast %73 : vector<1x16x128xf32> to vector<16x128xf32>
    %75 = vector.shape_cast %72 : vector<16x128xf32> to vector<1x16x128xf32>
    tpu.vector_store %arg8[%c0_69, %c0_70, %c0_71], %75 {strides = array<i32>} : memref<1x16x128xf32, #tpu.memory_space<vmem>>, vector<1x16x128xf32>,
    return
  }
  func.func @transform_0(%arg0: i32) -> (i32, i32, i32) {
    %c0_i32 = arith.constant 0 : i32
    %c0_i32_0 = arith.constant 0 : i32
    %c0_i32_1 = arith.constant 0 : i32
    return %arg0, %c0_i32, %c0_i32_0 : i32, i32, i32
  }
  func.func @transform_1(%arg0: i32) -> (i32, i32, i32) {
    %c0_i32 = arith.constant 0 : i32
    %c0_i32_0 = arith.constant 0 : i32
    %c0_i32_1 = arith.constant 0 : i32
    %c0_i32_2 = arith.constant 0 : i32
    return %c0_i32, %c0_i32_0, %c0_i32_1 : i32, i32, i32
  }
  func.func @transform_2(%arg0: i32) -> (i32, i32, i32) {
    %c0_i32 = arith.constant 0 : i32
    %c0_i32_0 = arith.constant 0 : i32
    %c0_i32_1 = arith.constant 0 : i32
    %c0_i32_2 = arith.constant 0 : i32
    return %c0_i32, %c0_i32_0, %c0_i32_1 : i32, i32, i32
  }
  func.func @transform_3(%arg0: i32) -> (i32, i32, i32) {
    %c0_i32 = arith.constant 0 : i32
    %c0_i32_0 = arith.constant 0 : i32
    %c0_i32_1 = arith.constant 0 : i32
    %c0_i32_2 = arith.constant 0 : i32
    return %c0_i32, %c0_i32_0, %c0_i32_1 : i32, i32, i32
  }
  func.func @transform_4(%arg0: i32) -> (i32, i32) {
    %c0_i32 = arith.constant 0 : i32
    %c0_i32_0 = arith.constant 0 : i32
    %c0_i32_1 = arith.constant 0 : i32
    return %c0_i32, %c0_i32_0 : i32, i32
  }
  func.func @transform_5(%arg0: i32) -> (i32, i32) {
    %c0_i32 = arith.constant 0 : i32
    %c0_i32_0 = arith.constant 0 : i32
    %c0_i32_1 = arith.constant 0 : i32
    return %c0_i32, %c0_i32_0 : i32, i32
  }
  func.func @transform_6(%arg0: i32) -> (i32, i32) {
    %c0_i32 = arith.constant 0 : i32
    %c0_i32_0 = arith.constant 0 : i32
    %c0_i32_1 = arith.constant 0 : i32
    return %c0_i32, %c0_i32_0 : i32, i32
  }
  func.func @transform_7(%arg0: i32) -> (i32, i32, i32) {
    %c0_i32 = arith.constant 0 : i32
    %c0_i32_0 = arith.constant 0 : i32
    %c0_i32_1 = arith.constant 0 : i32
    return %arg0, %c0_i32, %c0_i32_0 : i32, i32, i32
  }
}

</mosaic_0001>

<bundles_post_ra>
// kernel: up_concat_forward.1
= control target key start
LH: loop header
LB: loop body
LE: loop exit
PB: predicated region body
PF: predicated region fallthrough
CT: control target
= control target key end

     0   :  { %s2313_s24 = smov 0   ;;  %s2708_s0 = inlined_call_operand.vmem [shape: bf16[2,16,256], index: 0, kind: input, shape index: {}]   ;;  %s2709_s1 = inlined_call_operand.vmem [shape: bf16[3,256,128], index: 1, kind: input, shape index: {}]   ;;  %s2710_s2 = inlined_call_operand.vmem [shape: bf16[3,128,128], index: 2, kind: input, shape index: {}]   ;;  %s2711_s3 = inlined_call_operand.vmem [shape: bf16[3,128,128], index: 3, kind: input, shape index: {}]   ;;  %s2712_s4 = inlined_call_operand.vmem [shape: f32[1,128], index: 4, kind: input, shape index: {}]   ;;  %s2713_s5 = inlined_call_operand.vmem [shape: f32[1,128], index: 5, kind: input, shape index: {}]   ;;  %s2714_s6 = inlined_call_operand.vmem [shape: f32[1,128], index: 6, kind: input, shape index: {}]   ;;  %s2715_s7 = inlined_call_operand.vmem [shape: f32[2,16,128], index: 7, kind: output, shape index: {}]  }
   0x1 LB: > { %s1669_s25 = sadd.s32 4294967295, %s2268_s24   ;;  %p1673_p0 = scmp.ge.s32.totalorder %s2268_s24, 1  ;;  %s2268_s24 = sphi %s2313_s24, %s17_s24  }
   0x2   : > { %p237_p1 = scmp.lt.s32.totalorder %s2268_s24, 3 }
   0x4   : > { %p238_p2 = pnand %p1673_p0, %p237_p1 }
   0x5   : > { %p269_p3 = scmp.lt.s32.totalorder (!%p238_p2), %s1669_s25, 1  ;;  %p1678_p4 = scmp.ne.s32.totalorder (!%p238_p2), %s1669_s25, 0 }
   0x6   : > { %241 = sbr.rel (%p238_p2) target bundleno = 819 (0x333), region = 48 }
   0xd   : > { %s270_s26 = scalar_select %p269_p3, %s1669_s25, 1 }
   0xe   : > { %283 = sbr.rel (%p1678_p4) target bundleno = 21 (0x15), region = 52  ;;  %v2270_v0 = vmov (!%p1678_p4), 0  }
   0xf   : > { %s1910_s27 = sshll.u32 %s270_s26, 4  ;;  %284 = vst [vmem:[#allocation2] sm:$0xff] (!%p1678_p4), %v2270_v0  ;;  %285 = vst [vmem:[#allocation2 + $0x8] sm:$0xff] (!%p1678_p4), %v2270_v0 }
  0x10   : > { %s2324_s30 = scalar_lea.vmem %s2708_s0, %s1910_s27  ;;  %s2329_s10 = scalar_lea.vmem %s2715_s7, %s1910_s27  ;;  %286 = vst [vmem:[#allocation2 + $0x20] sm:$0xff] (!%p1678_p4), %v2270_v0  ;;  %287 = vst [vmem:[#allocation2 + $0x28] sm:$0xff] (!%p1678_p4), %v2270_v0 }
  0x11   : > { %288 = vst [vmem:[#allocation3] sm:$0xff] (!%p1678_p4), %v2270_v0  ;;  %289 = vst [vmem:[#allocation3 + $0x10] sm:$0xff] (!%p1678_p4), %v2270_v0 }
  0x15 PF: > { %v2163_v1 = vld [vmem:[%s2709_s1 + $0xc0] sm:$0xff]   ;;  %v2167_v5 = vld [vmem:[%s2709_s1 + $0xc8] sm:$0xff]   ;;  %v2171_v9 = vld [vmem:[%s2709_s1 + $0xd0] sm:$0xff]   ;;  %vm510_vm0 = vsmask.f32 256  ;;  %vm2272_vm2 = vmmov 0  }
  0x16   : > { %v2164_v2 = vld [vmem:[%s2709_s1 + $0x40] sm:$0xff]   ;;  %1912 = vmatprep.subr.bf16.mxu0 %v2163_v1  ;;  %v2168_v6 = vld [vmem:[%s2709_s1 + $0x48] sm:$0xff]   ;;  %v2172_v10 = vld [vmem:[%s2709_s1 + $0x50] sm:$0xff]   ;;  %vm711_vm1 = vsmask.f32 7424 }
  0x17   : > { %v2165_v3 = vld [vmem:[%s2709_s1 + $0x80] sm:$0xff]   ;;  %1934 = vmatprep.subr.bf16.mxu1 %v2164_v2  ;;  %v2169_v7 = vld [vmem:[%s2709_s1 + $0x88] sm:$0xff]   ;;  %v2173_v11 = vld [vmem:[%s2709_s1 + $0x90] sm:$0xff]  }
  0x18   : > { %v2166_v4 = vld [vmem:[%s2709_s1] sm:$0xff]   ;;  %1913 = vmatpush3.bf16.msra.mxu0 %v2165_v3  ;;  %v2170_v8 = vld [vmem:[%s2709_s1 + $0x8] sm:$0xff]   ;;  %v2174_v12 = vld [vmem:[%s2709_s1 + $0x10] sm:$0xff]  }
  0x19   : > { %1935 = vmatpush3.bf16.msra.mxu1 %v2166_v4  ;;  %1914 = vmatprep.subr.bf16.mxu0 %v2167_v5  ;;  %v2175_v13 = vld [vmem:[%s2709_s1 + $0xd8] sm:$0xff]   ;;  %v2179_v17 = vld [vmem:[%s2709_s1 + $0xe0] sm:$0xff]   ;;  %v2183_v21 = vld [vmem:[%s2709_s1 + $0xe8] sm:$0xff]  }
  0x1a   : > { %1936 = vmatprep.subr.bf16.mxu1 %v2168_v6  ;;  %v2176_v14 = vld [vmem:[%s2709_s1 + $0x58] sm:$0xff]   ;;  %v2180_v18 = vld [vmem:[%s2709_s1 + $0x60] sm:$0xff]   ;;  %v2184_v22 = vld [vmem:[%s2709_s1 + $0x68] sm:$0xff]  }
  0x1b   : > { %v2177_v15 = vld [vmem:[%s2709_s1 + $0x98] sm:$0xff]   ;;  %v2181_v19 = vld [vmem:[%s2709_s1 + $0xa0] sm:$0xff]   ;;  %v2185_v23 = vld [vmem:[%s2709_s1 + $0xa8] sm:$0xff]  }
  0x1c   : > { %1915 = vmatpush3.bf16.msra.mxu0 %v2169_v7  ;;  %v2178_v16 = vld [vmem:[%s2709_s1 + $0x18] sm:$0xff]   ;;  %v2182_v20 = vld [vmem:[%s2709_s1 + $0x20] sm:$0xff]   ;;  %v2186_v24 = vld [vmem:[%s2709_s1 + $0x28] sm:$0xff]  }
  0x1d   : > { %1937 = vmatpush3.bf16.msra.mxu1 %v2170_v8  ;;  %1916 = vmatprep.subr.bf16.mxu0 %v2171_v9  ;;  %v2187_v25 = vld [vmem:[%s2709_s1 + $0xf0] sm:$0xff]   ;;  %v2191_v29 = vld [vmem:[%s2709_s1 + $0xf8] sm:$0xff]   ;;  %v2195_v33 = vld [vmem:[%s2324_s30 + $0x4] ss:$8 sps:$4 sm:$0xff]  }
  0x1e   : > { %1938 = vmatprep.subr.bf16.mxu1 %v2172_v10  ;;  %v2188_v26 = vld [vmem:[%s2709_s1 + $0x70] sm:$0xff]   ;;  %v2192_v30 = vld [vmem:[%s2709_s1 + $0x78] sm:$0xff]   ;;  %v305_v34 = vld [vmem:[#allocation2 + $0x8] sm:$0x80]  ;;  %501 = vmatprep.mubr.bf16.mxu0 %v2195_v33  ;;  %v528_v37 = vshrl.u32 %v2195_v33, 16  ;;  %v531_v38 = vshll.u32 %v2195_v33, 16 }
  0x1f   : > { %v2189_v27 = vld [vmem:[%s2709_s1 + $0xb0] sm:$0xff]   ;;  %v2193_v31 = vld [vmem:[%s2709_s1 + $0xb8] sm:$0xff]   ;;  %v2429_v35 = vld [vmem:[%s2324_s30] ss:$8 sps:$4 sm:$0xff]   ;;  %v524_v39 = vshrl.u32 %v305_v34, 16 }
  0x20   : > { %1917 = vmatpush3.bf16.msra.mxu0 %v2173_v11  ;;  %v2190_v28 = vld [vmem:[%s2709_s1 + $0x30] sm:$0xff]   ;;  %v2194_v32 = vld [vmem:[%s2709_s1 + $0x38] sm:$0xff]   ;;  %v304_v36 = vld [vmem:[#allocation2] sm:$0x80]  ;;  %v516_v41 = vshrl.u32 %v2429_v35, 16  ;;  %v519_v42 = vshll.u32 %v2429_v35, 16 }
  0x21   : > { %1939 = vmatpush3.bf16.msra.mxu1 %v2174_v12  ;;  %1918 = vmatprep.subr.bf16.mxu0 %v2175_v13  ;;  %v512_v40 = vshrl.u32 %v304_v36, 16  ;;  %v2198_v43 = vld [vmem:[%s2709_s1 + $0x140] sm:$0xff]   ;;  %v530_v45 = vrot.slane %v528_v37, 7  ;;  %v526_v46 = vrot.slane %v524_v39, 7  ;;  %v2200_v48 = vld [vmem:[%s2709_s1 + $0x148] sm:$0xff]   ;;  %v2202_v53 = vld [vmem:[%s2709_s1 + $0x150] sm:$0xff]  }
  0x22   : > { %1940 = vmatprep.subr.bf16.mxu1 %v2176_v14  ;;  %v2199_v44 = vld [vmem:[%s2709_s1 + $0x100] sm:$0xff]   ;;  %v518_v49 = vrot.slane %v516_v41, 7  ;;  %v2201_v50 = vld [vmem:[%s2709_s1 + $0x108] sm:$0xff]   ;;  %v2203_v56 = vld [vmem:[%s2709_s1 + $0x110] sm:$0xff]   ;;  %v729_v60 = vrot.slane %v531_v38, 1  ;;  %v717_v63 = vrot.slane %v519_v42, 1 }
  0x23   : > { %v514_v47 = vrot.slane %v512_v40, 7  ;;  %v533_v51 = vor.u32 %v531_v38, %v530_v45  ;;  %v2204_v57 = vld [vmem:[%s2709_s1 + $0x158] sm:$0xff]   ;;  %v2206_v59 = vld [vmem:[%s2709_s1 + $0x160] sm:$0xff]   ;;  %v2208_v62 = vld [vmem:[%s2709_s1 + $0x168] sm:$0xff]  }
  0x24   : > { %1919 = vmatpush3.bf16.msra.mxu0 %v2177_v15  ;;  %v521_v52 = vor.u32 %v519_v42, %v518_v49  ;;  %v2205_v58 = vld [vmem:[%s2709_s1 + $0x118] sm:$0xff]   ;;  %v2207_v61 = vld [vmem:[%s2709_s1 + $0x120] sm:$0xff]   ;;  %v677_v0 = vld [vmem:[#allocation2 + $0x28] sm:$0x1]  ;;  %v730_v3 = vor.u32 %v729_v60, %v528_v37  ;;  %v718_v13 = vor.u32 %v717_v63, %v516_v41 }
  0x25   : > { %1941 = vmatpush3.bf16.msra.mxu1 %v2178_v16  ;;  %1920 = vmatprep.subr.bf16.mxu0 %v2179_v17  ;;  %v534_v54 = vsel %vm510_vm0, %v526_v46, %v533_v51  ;;  %v676_v1 = vld [vmem:[#allocation2 + $0x20] sm:$0x1]  ;;  %v2209_v2 = vld [vmem:[%s2709_s1 + $0x128] sm:$0xff]   ;;  %v732_v4 = vshll.u32 %v677_v0, 16  ;;  %v2210_v6 = vld [vmem:[%s2709_s1 + $0x170] sm:$0xff]   ;;  %v2271_v16 = vmov 0.0  }
  0x26   : > { %1942 = vmatprep.subr.bf16.mxu1 %v2180_v18  ;;  %665 = vmatprep.mubr.bf16.mxu1 %v534_v54  ;;  %v522_v55 = vsel %vm510_vm0, %v514_v47, %v521_v52  ;;  %v720_v5 = vshll.u32 %v676_v1, 16  ;;  %v2211_v9 = vld [vmem:[%s2709_s1 + $0x130] sm:$0xff]   ;;  %v2212_v11 = vld [vmem:[%s2709_s1 + $0x178] sm:$0xff]   ;;  %v2214_v15 = vld [vmem:[%s2710_s2 + $0x40] sm:$0xff]  }
  0x27   : > { %v734_v7 = vrot.slane %v732_v4, 1  ;;  %v2213_v12 = vld [vmem:[%s2709_s1 + $0x138] sm:$0xff]   ;;  %v2217_v17 = vld [vmem:[%s2710_s2] sm:$0xff]   ;;  %v2215_v18 = vld [vmem:[%s2710_s2 + $0x48] sm:$0xff]  }
  0x28   : > { %1921 = vmatpush3.bf16.msra.mxu0 %v2181_v19  ;;  %v722_v8 = vrot.slane %v720_v5, 1  ;;  %v2216_v19 = vld [vmem:[%s2710_s2 + $0x50] sm:$0xff]   ;;  %v2229_v60 = vld [vmem:[%s2710_s2 + $0x80] sm:$0xff]   ;;  %v2231_v0 = vld [vmem:[%s2710_s2 + $0x88] sm:$0xff]  }
  0x29   : > { %1943 = vmatpush3.bf16.msra.mxu1 %v2182_v20  ;;  %1922 = vmatprep.subr.bf16.mxu0 %v2183_v21  ;;  %v735_v10 = vsel %vm711_vm1, %v730_v3, %v734_v7  ;;  %v2218_v20 = vld [vmem:[%s2710_s2 + $0x58] sm:$0xff]   ;;  %v2219_v21 = vld [vmem:[%s2710_s2 + $0x8] sm:$0xff]   ;;  %v2232_v5 = vld [vmem:[%s2710_s2 + $0x90] sm:$0xff]  }
  0x2a   : > { %1944 = vmatprep.subr.bf16.mxu1 %v2184_v22  ;;  %v723_v14 = vsel %vm711_vm1, %v718_v13, %v722_v8  ;;  %v2220_v22 = vld [vmem:[%s2710_s2 + $0x60] sm:$0xff]   ;;  %v2233_v7 = vld [vmem:[%s2710_s2 + $0x98] sm:$0xff]  }
  0x2b   : > { %v2234_v8 = vld [vmem:[%s2710_s2 + $0xa0] sm:$0xff]  }
  0x2c   : > { %1923 = vmatpush3.bf16.msra.mxu0 %v2185_v23  ;;  %v2221_v23 = vld [vmem:[%s2710_s2 + $0x10] sm:$0xff]  }
  0x2d   : > { %1945 = vmatpush3.bf16.msra.mxu1 %v2186_v24  ;;  %1924 = vmatprep.subr.bf16.mxu0 %v2187_v25  ;;  %v2222_v24 = vld [vmem:[%s2710_s2 + $0x68] sm:$0xff]   ;;  %v2223_v25 = vld [vmem:[%s2710_s2 + $0x18] sm:$0xff]  }
  0x2e   : > { %1946 = vmatprep.subr.bf16.mxu1 %v2188_v26  ;;  %v2224_v26 = vld [vmem:[%s2710_s2 + $0x70] sm:$0xff]  }
  0x30   : > { %1925 = vmatpush3.bf16.msra.mxu0 %v2189_v27  ;;  %v2225_v27 = vld [vmem:[%s2710_s2 + $0x20] sm:$0xff]  }
  0x31   : > { %1947 = vmatpush3.bf16.msra.mxu1 %v2190_v28  ;;  %1926 = vmatprep.subr.bf16.mxu0 %v2191_v29  ;;  %v2226_v28 = vld [vmem:[%s2710_s2 + $0x78] sm:$0xff]   ;;  %v2227_v29 = vld [vmem:[%s2710_s2 + $0x28] sm:$0xff]  }
  0x32   : > { %1948 = vmatprep.subr.bf16.mxu1 %v2192_v30  ;;  %v2228_v30 = vld [vmem:[%s2710_s2 + $0x30] sm:$0xff]  }
  0x34   : > { %1927 = vmatpush3.bf16.msra.mxu0 %v2193_v31  ;;  %v2230_v31 = vld [vmem:[%s2710_s2 + $0x38] sm:$0xff]  }
  0x35   : > { %1949 = vmatpush3.bf16.msra.mxu1 %v2194_v32  ;;  %1956 = vmatprep.subr.bf16.mxu0 %v2198_v43 }
  0x36   : > { %2032 = vmatprep.subr.bf16.mxu1 %v2271_v16 }
  0x37   : > { %502 = vmatmul.mubr.bf16.vlgmr.msra.gmra.mrb[0].mxu0 %v2429_v35 }
  0x38   : > { %1957 = vmatpush3.bf16.msra.mxu0 %v2199_v44  ;;  %666 = vmatmul.mubr.bf16.vlgmr.msra.gmra.mrb[0].mxu1 %v522_v55 }
  0x39   : > { %1958 = vmatprep.subr.bf16.mxu0 %v2200_v48  ;;  %866 = vmatprep.mubr.bf16.mxu0 %v735_v10  ;;  %v1117_v10 = vld [vmem:[#allocation3 + $0x10] sm:$0x1] }
  0x3a   : > { %2033 = vmatpush3.bf16.msra.mxu1 %v2214_v15  ;;  %2048 = vmatprep.mubr.msk.bf16.mxu1 %vm2272_vm2, %v2271_v16  ;;  %v1143_v13 = vshll.u32 %v1117_v10, 16 }
  0x3b   : > { %2034 = vmatprep.subr.bf16.mxu1 %v2271_v16 }
  0x3c   : > { %1959 = vmatpush3.bf16.msra.mxu0 %v2201_v50  ;;  %v1793_v50 = vld [vmem:[%s2712_s4] ss:$0 sm:$0xff] }
  0x3d   : > { %1960 = vmatprep.subr.bf16.mxu0 %v2202_v53 }
  0x3e   : > { %2035 = vmatpush3.bf16.msra.mxu1 %v2215_v18 }
  0x3f   : > { %2036 = vmatprep.subr.bf16.mxu1 %v2271_v16 }
  0x40   : > { %1961 = vmatpush3.bf16.msra.mxu0 %v2203_v56 }
  0x41   : > { %1962 = vmatprep.subr.bf16.mxu0 %v2204_v57  ;;  %v890_v57 = vld [vmem:[#allocation3] sm:$0x80] }
  0x42   : > { %2037 = vmatpush3.bf16.msra.mxu1 %v2216_v19  ;;  %v2238_v19 = vld [vmem:[%s2711_s3 + $0x40] sm:$0xff]  }
  0x43   : > { %2038 = vmatprep.subr.bf16.mxu1 %v2271_v16 }
  0x44   : > { %1963 = vmatpush3.bf16.msra.mxu0 %v2205_v58 }
  0x45   : > { %1964 = vmatprep.subr.bf16.mxu0 %v2206_v59 }
  0x46   : > { %2039 = vmatpush3.bf16.msra.mxu1 %v2218_v20  ;;  %v2241_v20 = vld [vmem:[%s2711_s3] sm:$0xff]  }
  0x47   : > { %2040 = vmatprep.subr.bf16.mxu1 %v2271_v16 }
  0x48   : > { %1965 = vmatpush3.bf16.msra.mxu0 %v2207_v61 }
  0x49   : > { %1966 = vmatprep.subr.bf16.mxu0 %v2208_v62  ;;  %v1015_v62 = vshrl.u32 %v890_v57, 16  ;;  %v2253_v57 = vld [vmem:[%s2711_s3 + $0x80] sm:$0xff]  }
  0x4a   : > { %2041 = vmatpush3.bf16.msra.mxu1 %v2220_v22  ;;  %v2243_v22 = vld [vmem:[%s2711_s3 + $0x8] sm:$0xff]  }
  0x4b   : > { %2042 = vmatprep.subr.bf16.mxu1 %v2271_v16  ;;  %v1017_v3 = vrot.slane %v1015_v62, 7 }
  0x4c   : > { %1967 = vmatpush3.bf16.msra.mxu0 %v2209_v2 }
  0x4d   : > { %1968 = vmatprep.subr.bf16.mxu0 %v2210_v6 }
  0x4e   : > { %2043 = vmatpush3.bf16.msra.mxu1 %v2222_v24  ;;  %v2242_v24 = vld [vmem:[%s2711_s3 + $0x58] sm:$0xff]  }
  0x4f   : > { %2044 = vmatprep.subr.bf16.mxu1 %v2271_v16 }
  0x50   : > { %1969 = vmatpush3.bf16.msra.mxu0 %v2211_v9  ;;  %v2235_v9 = vld [vmem:[%s2710_s2 + $0xa8] sm:$0xff]  }
  0x51   : > { %1970 = vmatprep.subr.bf16.mxu0 %v2212_v11  ;;  %v2236_v11 = vld [vmem:[%s2710_s2 + $0xb0] sm:$0xff]  }
  0x52   : > { %2045 = vmatpush3.bf16.msra.mxu1 %v2224_v26  ;;  %v2245_v26 = vld [vmem:[%s2711_s3 + $0x10] sm:$0xff]  }
  0x53   : > { %2046 = vmatprep.subr.bf16.mxu1 %v2271_v16 }
  0x54   : > { %1971 = vmatpush3.bf16.msra.mxu0 %v2213_v12 }
  0x55   : > { %2052 = vmatprep.subr.bf16.mxu0 %v2271_v16 }
  0x56   : > { %2047 = vmatpush3.bf16.msra.mxu1 %v2226_v28  ;;  %v2247_v28 = vld [vmem:[%s2711_s3 + $0x18] sm:$0xff]  }
  0x57   : > { %867 = vmatmul.mubr.bf16.vlgmr.msra.gmra.mrb[4].mxu0 %v723_v14  ;;  %2072 = vmatprep.subr.bf16.mxu1 %v2271_v16  ;;  %v2237_v14 = vld [vmem:[%s2710_s2 + $0xb8] sm:$0xff]  }
  0x58   : > { %2053 = vmatpush3.bf16.msra.mxu0 %v2217_v17  ;;  %2068 = vmatprep.mubr.msk.bf16.mxu0 %vm2272_vm2, %v2271_v16  ;;  %v1145_v17 = vrot.slane %v1143_v13, 1 }
  0x59   : > { %2054 = vmatprep.subr.bf16.mxu0 %v2271_v16 }
  0x5c   : > { %2055 = vmatpush3.bf16.msra.mxu0 %v2219_v21  ;;  %v2239_v21 = vld [vmem:[%s2711_s3 + $0x48] sm:$0xff]  }
  0x5d   : > { %2056 = vmatprep.subr.bf16.mxu0 %v2271_v16 }
  0x60   : > { %2057 = vmatpush3.bf16.msra.mxu0 %v2221_v23  ;;  %v2240_v23 = vld [vmem:[%s2711_s3 + $0x50] sm:$0xff]  }
  0x61   : > { %2058 = vmatprep.subr.bf16.mxu0 %v2271_v16 }
  0x64   : > { %2059 = vmatpush3.bf16.msra.mxu0 %v2223_v25  ;;  %v2244_v25 = vld [vmem:[%s2711_s3 + $0x60] sm:$0xff]  }
  0x65   : > { %2060 = vmatprep.subr.bf16.mxu0 %v2271_v16 }
  0x68   : > { %2061 = vmatpush3.bf16.msra.mxu0 %v2225_v27  ;;  %v2246_v27 = vld [vmem:[%s2711_s3 + $0x68] sm:$0xff]  }
  0x69   : > { %2062 = vmatprep.subr.bf16.mxu0 %v2271_v16 }
  0x6c   : > { %2063 = vmatpush3.bf16.msra.mxu0 %v2227_v29  ;;  %v2248_v29 = vld [vmem:[%s2711_s3 + $0x70] sm:$0xff]  }
  0x6d   : > { %2064 = vmatprep.subr.bf16.mxu0 %v2271_v16 }
  0x70   : > { %2065 = vmatpush3.bf16.msra.mxu0 %v2228_v30  ;;  %v2249_v30 = vld [vmem:[%s2711_s3 + $0x20] sm:$0xff]  }
  0x71   : > { %2066 = vmatprep.subr.bf16.mxu0 %v2271_v16 }
  0x74   : > { %2067 = vmatpush3.bf16.msra.mxu0 %v2230_v31  ;;  %v2250_v31 = vld [vmem:[%s2711_s3 + $0x78] sm:$0xff]  }
  0x75   : > { %2092 = vmatprep.subr.bf16.mxu0 %v2271_v16 }
 0x10a   : > { %v1928_v32 = vpop.f32.mrb[0].mxu0 }
 0x10b   : > { %v1929_v33 = vpop.f32.mrb[1].mxu0  ;;  %v1950_v38 = vpop.f32.mrb[0].mxu1 }
 0x10c   : > { %v1930_v34 = vadd.f32 %v1929_v33, %v1928_v32  ;;  %v1931_v35 = vpop.f32.mrb[2].mxu0  ;;  %v1951_v39 = vpop.f32.mrb[1].mxu1  ;;  %v2251_v32 = vld [vmem:[%s2711_s3 + $0x28] sm:$0xff]   ;;  %v2252_v33 = vld [vmem:[%s2711_s3 + $0x30] sm:$0xff]  }
 0x10d   : > { %v1932_v36 = vpop.f32.mrb[3].mxu0  ;;  %v1952_v40 = vadd.f32 %v1951_v39, %v1950_v38  ;;  %v1953_v41 = vpop.f32.mrb[2].mxu1 }
 0x10e   : > { %v1933_v37 = vadd.f32 %v1932_v36, %v1931_v35  ;;  %v1954_v42 = vpop.f32.mrb[3].mxu1 }
 0x10f   : > { %v668_v43 = vadd.f32 %v1952_v40, %v1930_v34  ;;  %v1955_v44 = vadd.f32 %v1954_v42, %v1953_v41  ;;  %v2254_v34 = vld [vmem:[%s2711_s3 + $0x38] sm:$0xff]  }
 0x111   : > { %v671_v45 = vadd.f32 %v1955_v44, %v1933_v37 }
 0x12a   : > { %v1972_v46 = vpop.f32.mrb[4].mxu0 }
 0x12b   : > { %v1973_v47 = vpop.f32.mrb[5].mxu0 }
 0x12c   : > { %v1974_v48 = vadd.f32 %v1973_v47, %v1972_v46  ;;  %v1975_v49 = vpop.f32.mrb[6].mxu0  ;;  %v1850_v46 = vld [vmem:[%s2713_s5] ss:$0 sm:$0xff] }
 0x12d   : > { %v1976_v51 = vpop.f32.mrb[7].mxu0 }
 0x12e   : > { %v875_v52 = vadd.f32 %v1974_v48, %v668_v43  ;;  %v1977_v53 = vadd.f32 %v1976_v51, %v1975_v49 }
 0x130   : > { %v884_v54 = vadd.f32 %v1793_v50, %v875_v52  ;;  %v876_v55 = vadd.f32 %v1977_v53, %v671_v45 }
 0x132   : > { %v885_v56 = vadd.f32 %v1793_v50, %v876_v55  ;;  %v886_v58 = vmax.f32 %v884_v54, 0.0  ;;  %v1252_v54 = vld [vmem:[#allocation3] sm:$0x80] }
 0x134   : > { %v887_v59 = vmax.f32 %v885_v56, 0.0 }
 0x136   : > { %v888_v61 = vpack.c.bf16 %v887_v59, %v886_v58  ;;  %v1377_v59 = vshrl.u32 %v1252_v54, 16 }
 0x138   : > { %2049 = vmatmul.mubr.bf16.vlgmr.msra.gmra.mrb[4].mxu1 %v888_v61  ;;  %v1019_v63 = vshrl.u32 %v888_v61, 16  ;;  %v1022_v2 = vshll.u32 %v888_v61, 16  ;;  %v2255_v61 = vld [vmem:[%s2711_s3 + $0x88] sm:$0xff]  }
 0x139   : > { %2073 = vmatpush3.bf16.msra.mxu1 %v2229_v60  ;;  %2088 = vmatprep.mubr.msk.bf16.mxu1 %vm2272_vm2, %v2271_v16 }
 0x13a   : > { %v1021_v1 = vrot.slane %v1019_v63, 7  ;;  %2074 = vmatprep.subr.bf16.mxu1 %v2271_v16  ;;  %v1140_v12 = vrot.slane %v1022_v2, 1 }
 0x13c   : > { %v1024_v4 = vor.u32 %v1022_v2, %v1021_v1  ;;  %v1141_v15 = vor.u32 %v1140_v12, %v1019_v63  ;;  %v2256_v2 = vld [vmem:[%s2711_s3 + $0x90] sm:$0xff]  }
 0x13d   : > { %2075 = vmatpush3.bf16.msra.mxu1 %v2231_v0  ;;  %v1379_v0 = vrot.slane %v1377_v59, 7 }
 0x13e   : > { %v1025_v6 = vsel %vm510_vm0, %v1017_v3, %v1024_v4  ;;  %2076 = vmatprep.subr.bf16.mxu1 %v2271_v16  ;;  %v1146_v18 = vsel %vm711_vm1, %v1141_v15, %v1145_v17  ;;  %v2257_v4 = vld [vmem:[%s2711_s3 + $0x98] sm:$0xff]  }
 0x13f   : > { %2069 = vmatmul.mubr.bf16.vlgmr.msra.gmra.mrb[8].mxu0 %v1025_v6  ;;  %v2259_v6 = vld [vmem:[%s2711_s3 + $0xa8] sm:$0xff]  }
 0x140   : > { %2108 = vmatprep.mubr.msk.bf16.mxu0 %vm2272_vm2, %v2271_v16  ;;  %2093 = vmatpush3.bf16.msra.mxu0 %v2238_v19 }
 0x141   : > { %2077 = vmatpush3.bf16.msra.mxu1 %v2232_v5  ;;  %2094 = vmatprep.subr.bf16.mxu0 %v2271_v16  ;;  %v2258_v5 = vld [vmem:[%s2711_s3 + $0xa0] sm:$0xff]  }
 0x142   : > { %2078 = vmatprep.subr.bf16.mxu1 %v2271_v16 }
 0x144   : > { %2095 = vmatpush3.bf16.msra.mxu0 %v2239_v21 }
 0x145   : > { %2079 = vmatpush3.bf16.msra.mxu1 %v2233_v7  ;;  %2096 = vmatprep.subr.bf16.mxu0 %v2271_v16  ;;  %v1479_v7 = vld [vmem:[#allocation3 + $0x10] sm:$0x1] }
 0x146   : > { %2080 = vmatprep.subr.bf16.mxu1 %v2271_v16  ;;  %v1505_v10 = vshll.u32 %v1479_v7, 16 }
 0x148   : > { %2097 = vmatpush3.bf16.msra.mxu0 %v2240_v23  ;;  %v1507_v13 = vrot.slane %v1505_v10, 1 }
 0x149   : > { %2081 = vmatpush3.bf16.msra.mxu1 %v2234_v8  ;;  %2098 = vmatprep.subr.bf16.mxu0 %v2271_v16  ;;  %v2260_v8 = vld [vmem:[%s2711_s3 + $0xb0] sm:$0xff]  }
 0x14a   : > { %2082 = vmatprep.subr.bf16.mxu1 %v2271_v16 }
 0x14c   : > { %2099 = vmatpush3.bf16.msra.mxu0 %v2242_v24 }
 0x14d   : > { %2083 = vmatpush3.bf16.msra.mxu1 %v2235_v9  ;;  %2100 = vmatprep.subr.bf16.mxu0 %v2271_v16 }
 0x14e   : > { %2084 = vmatprep.subr.bf16.mxu1 %v2271_v16 }
 0x150   : > { %2101 = vmatpush3.bf16.msra.mxu0 %v2244_v25 }
 0x151   : > { %2085 = vmatpush3.bf16.msra.mxu1 %v2236_v11  ;;  %2102 = vmatprep.subr.bf16.mxu0 %v2271_v16  ;;  %v2261_v11 = vld [vmem:[%s2711_s3 + $0xb8] sm:$0xff]  }
 0x152   : > { %2086 = vmatprep.subr.bf16.mxu1 %v2271_v16 }
 0x154   : > { %2103 = vmatpush3.bf16.msra.mxu0 %v2246_v27 }
 0x155   : > { %2087 = vmatpush3.bf16.msra.mxu1 %v2237_v14  ;;  %2104 = vmatprep.subr.bf16.mxu0 %v2271_v16 }
 0x156   : > { %2112 = vmatprep.subr.bf16.mxu1 %v2271_v16 }
 0x158   : > { %2089 = vmatmul.mubr.bf16.vlgmr.msra.gmra.mrb[8].mxu1 %v1146_v18  ;;  %2105 = vmatpush3.bf16.msra.mxu0 %v2248_v29 }
 0x159   : > { %2128 = vmatprep.mubr.msk.bf16.mxu1 %vm2272_vm2, %v2271_v16  ;;  %2113 = vmatpush3.bf16.msra.mxu1 %v2241_v20 }
 0x15a   : > { %2114 = vmatprep.subr.bf16.mxu1 %v2271_v16  ;;  %2106 = vmatprep.subr.bf16.mxu0 %v2271_v16 }
 0x15c   : > { %2107 = vmatpush3.bf16.msra.mxu0 %v2250_v31 }
 0x15d   : > { %2115 = vmatpush3.bf16.msra.mxu1 %v2243_v22  ;;  %2132 = vmatprep.subr.bf16.mxu0 %v2271_v16 }
 0x15e   : > { %2116 = vmatprep.subr.bf16.mxu1 %v2271_v16 }
 0x161   : > { %2117 = vmatpush3.bf16.msra.mxu1 %v2245_v26 }
 0x162   : > { %2118 = vmatprep.subr.bf16.mxu1 %v2271_v16 }
 0x165   : > { %2119 = vmatpush3.bf16.msra.mxu1 %v2247_v28 }
 0x166   : > { %2120 = vmatprep.subr.bf16.mxu1 %v2271_v16 }
 0x169   : > { %2121 = vmatpush3.bf16.msra.mxu1 %v2249_v30 }
 0x16a   : > { %2122 = vmatprep.subr.bf16.mxu1 %v2271_v16 }
 0x16d   : > { %2123 = vmatpush3.bf16.msra.mxu1 %v2251_v32 }
 0x16e   : > { %2124 = vmatprep.subr.bf16.mxu1 %v2271_v16 }
 0x171   : > { %2125 = vmatpush3.bf16.msra.mxu1 %v2252_v33 }
 0x172   : > { %2126 = vmatprep.subr.bf16.mxu1 %v2271_v16 }
 0x175   : > { %2127 = vmatpush3.bf16.msra.mxu1 %v2254_v34 }
 0x20b   : > { %v1007_v35 = vpop.f32.mrb[4].mxu1 }
 0x20c   : > { %v2050_v36 = vpop.f32.mrb[5].mxu1 }
 0x20d   : > { %v1010_v37 = vpop.f32.mrb[6].mxu1 }
 0x20e   : > { %v2051_v38 = vpop.f32.mrb[7].mxu1 }
 0x212   : > { %v1109_v39 = vpop.f32.mrb[8].mxu0 }
 0x213   : > { %v1110_v40 = vadd.f32 %v1109_v39, %v1007_v35  ;;  %v2070_v41 = vpop.f32.mrb[9].mxu0 }
 0x214   : > { %v1112_v42 = vpop.f32.mrb[10].mxu0 }
 0x215   : > { %v1113_v43 = vadd.f32 %v1112_v42, %v1010_v37  ;;  %v2071_v44 = vpop.f32.mrb[11].mxu0 }
 0x22b   : > { %v1230_v45 = vpop.f32.mrb[8].mxu1 }
 0x22c   : > { %v1237_v47 = vadd.f32 %v1230_v45, %v1110_v40  ;;  %v2090_v48 = vpop.f32.mrb[9].mxu1 }
 0x22d   : > { %v1233_v49 = vpop.f32.mrb[10].mxu1 }
 0x22e   : > { %v1246_v50 = vadd.f32 %v1850_v46, %v1237_v47  ;;  %v1238_v51 = vadd.f32 %v1233_v49, %v1113_v43  ;;  %v2091_v52 = vpop.f32.mrb[11].mxu1 }
 0x230   : > { %v1247_v53 = vadd.f32 %v1850_v46, %v1238_v51  ;;  %v1248_v55 = vmax.f32 %v1246_v50, 0.0 }
 0x232   : > { %v1249_v56 = vmax.f32 %v1247_v53, 0.0 }
 0x234   : > { %v1250_v58 = vpack.c.bf16 %v1249_v56, %v1248_v55 }
 0x236   : > { %2109 = vmatmul.mubr.bf16.vlgmr.msra.gmra.mrb[12].mxu0 %v1250_v58  ;;  %v1381_v60 = vshrl.u32 %v1250_v58, 16  ;;  %v1384_v63 = vshll.u32 %v1250_v58, 16 }
 0x237   : > { %2133 = vmatpush3.bf16.msra.mxu0 %v2253_v57  ;;  %2148 = vmatprep.mubr.msk.bf16.mxu0 %vm2272_vm2, %v2271_v16 }
 0x238   : > { %v1383_v62 = vrot.slane %v1381_v60, 7  ;;  %2134 = vmatprep.subr.bf16.mxu0 %v2271_v16  ;;  %v1502_v9 = vrot.slane %v1384_v63, 1 }
 0x23a   : > { %v1386_v1 = vor.u32 %v1384_v63, %v1383_v62  ;;  %v1503_v12 = vor.u32 %v1502_v9, %v1381_v60 }
 0x23b   : > { %2135 = vmatpush3.bf16.msra.mxu0 %v2255_v61 }
 0x23c   : > { %v1387_v3 = vsel %vm510_vm0, %v1379_v0, %v1386_v1  ;;  %2136 = vmatprep.subr.bf16.mxu0 %v2271_v16  ;;  %v1508_v14 = vsel %vm711_vm1, %v1503_v12, %v1507_v13 }
 0x23d   : > { %2129 = vmatmul.mubr.bf16.vlgmr.msra.gmra.mrb[12].mxu1 %v1387_v3 }
 0x23f   : > { %2137 = vmatpush3.bf16.msra.mxu0 %v2256_v2 }
 0x240   : > { %2138 = vmatprep.subr.bf16.mxu0 %v2271_v16 }
 0x243   : > { %2139 = vmatpush3.bf16.msra.mxu0 %v2257_v4 }
 0x244   : > { %2140 = vmatprep.subr.bf16.mxu0 %v2271_v16 }
 0x247   : > { %2141 = vmatpush3.bf16.msra.mxu0 %v2258_v5 }
 0x248   : > { %2142 = vmatprep.subr.bf16.mxu0 %v2271_v16 }
 0x24b   : > { %2143 = vmatpush3.bf16.msra.mxu0 %v2259_v6 }
 0x24c   : > { %2144 = vmatprep.subr.bf16.mxu0 %v2271_v16 }
 0x24f   : > { %2145 = vmatpush3.bf16.msra.mxu0 %v2260_v8 }
 0x250   : > { %2146 = vmatprep.subr.bf16.mxu0 %v2271_v16  ;;  %v1907_v16 = vld [vmem:[%s2714_s6] ss:$0 sm:$0xff] }
 0x253   : > { %2147 = vmatpush3.bf16.msra.mxu0 %v2261_v11 }
 0x256   : > { %2149 = vmatmul.mubr.bf16.vlgmr.msra.gmra.mrb[16].mxu0 %v1508_v14 }
 0x309   : > { %v1369_v15 = vpop.f32.mrb[12].mxu0 }
 0x30a   : > { %v2110_v17 = vpop.f32.mrb[13].mxu0 }
 0x30b   : > { %v1372_v18 = vpop.f32.mrb[14].mxu0 }
 0x30c   : > { %v2111_v19 = vpop.f32.mrb[15].mxu0 }
 0x310   : > { %v1471_v20 = vpop.f32.mrb[12].mxu1 }
 0x311   : > { %v1472_v21 = vadd.f32 %v1471_v20, %v1369_v15  ;;  %v2130_v22 = vpop.f32.mrb[13].mxu1 }
 0x312   : > { %v1474_v23 = vpop.f32.mrb[14].mxu1 }
 0x313   : > { %v1475_v24 = vadd.f32 %v1474_v23, %v1372_v18  ;;  %v2131_v25 = vpop.f32.mrb[15].mxu1 }
 0x329   : > { %v1592_v26 = vpop.f32.mrb[16].mxu0 }
 0x32a   : > { %v1599_v27 = vadd.f32 %v1592_v26, %v1472_v21  ;;  %v2150_v28 = vpop.f32.mrb[17].mxu0 }
 0x32b   : > { %v1595_v29 = vpop.f32.mrb[18].mxu0 }
 0x32c   : > { %v1608_v30 = vadd.f32 %v1907_v16, %v1599_v27  ;;  %v1600_v31 = vadd.f32 %v1595_v29, %v1475_v24  ;;  %v2151_v32 = vpop.f32.mrb[19].mxu0 }
 0x32e   : > { %v1610_v33 = vmax.f32 %v1608_v30, 0.0  ;;  %v1609_v34 = vadd.f32 %v1907_v16, %v1600_v31 }
 0x330   : > { %1612 = vst [vmem:[%s2329_s10] sm:$0xff] %v1610_v33  ;;  %v1611_v35 = vmax.f32 %v1609_v34, 0.0 }
 0x332   : > { %1613 = vst [vmem:[%s2329_s10 + $0x8] sm:$0xff] %v1611_v35 }
 0x333 PF: > { %s17_s24 = sadd.s32 1, %s2268_s24  }
 0x334   : > { %p14_p5 = scmp.ge.s32.totalorder %s17_s24, 4  }
 0x336   :  { %16 = sbr.rel (!%p14_p5) target bundleno = 1 (0x1), region = 88 }

</bundles_post_ra>
